<compile_context>
chip_gen: v7x
topology: tpu7x:2x2x1
jax: 0.10.0
libtpu: 0.0.40
codegen_flags: <defaults>
</compile_context>

<pallas_src>
import functools

import numpy as np
import jax
import jax.numpy as jnp
from jax.experimental import pallas as pl
from jax.experimental.pallas import tpu as pltpu


# --------------------------- D2Q9 Dellar moment basis (host) ---------------------------
_E = np.array(
    [[0, 0], [1, 0], [0, 1], [-1, 0], [0, -1], [1, 1], [-1, 1], [-1, -1], [1, -1]],
    np.float64,
)
_G = np.array([1, -2, -2, -2, -2, 4, 4, 4, 4], np.float64)  # Dellar ghost vector
_M = np.stack(
    [
        np.ones(9),
        _E[:, 0], _E[:, 1],
        _E[:, 0] * _E[:, 0], _E[:, 0] * _E[:, 1], _E[:, 1] * _E[:, 1],
        _G, _G * _E[:, 0], _G * _E[:, 1],
    ],
    axis=0,
)  # (9 moments, 9 populations)
_MINV = np.linalg.inv(_M)
_FLIP = np.array([0, 2, 1, 5, 4, 3, 6, 8, 7], np.int32)  # swap x<->y in moment space

# Row layout of the single stacked matmul result r = W_stack @ [f; 1].
# All slice starts are multiples of 8 (no sublane relayouts).
_R_SHEAR = 0     # rows 0:3   -> m[3:6] - rho/3 * [1,0,1]
_R_JA = 8        # rows 8:11  -> [jx, jx, jy]
_R_JB = 16       # rows 16:19 -> [jx, jy, jy]
_R_GHOST = 24    # rows 24:27 -> m[6:9]
_R_RHO = 27      # row  27    -> rho
_R_HIDDEN = 32   # rows 32:128 -> fused MLP first-layer pre-activations (bias folded)
_N_HIDDEN = 96
_N_STACK = 128


# ------------------------------------- kernel ------------------------------------------
def learned_mrt_kernel(f_ref, wstk_ref, w2_ref, b2_ref, mi36_ref, mi69_ref, out_ref,
                       *, omega0):
    fo = f_ref[...]                                                       # (10, TN) bf16
    fo_mm = fo.astype(wstk_ref.dtype)

    # One stacked matmul: all moments needed in-kernel + both MLP first layers
    # (first-layer biases folded via the ones row of f).
    r = jnp.dot(wstk_ref[...], fo_mm, preferred_element_type=jnp.float32)  # (128, TN) f32

    # Learned relaxation rates for ghost moments 6,7,8 (fused second layer).
    h = jnp.maximum(r[_R_HIDDEN:_R_HIDDEN + _N_HIDDEN], 0.0).astype(jnp.bfloat16)
    g = jnp.dot(w2_ref[...], h, preferred_element_type=jnp.float32) + b2_ref[...]  # (3,TN)
    omega_g = pl.reciprocal(0.5 + jnp.exp(g), approx=True)                 # (3, TN)

    # Shear correction: omega0 * (m[3:6] - meq[3:6]); meq's rho/3 part is
    # pre-folded into the stacked weights, the quadratic part uses jx, jy rows.
    inv_rho = pl.reciprocal(r[_R_RHO:_R_RHO + 1], approx=True)             # (1, TN)
    quad = inv_rho * r[_R_JA:_R_JA + 3] * r[_R_JB:_R_JB + 3]               # (3, TN)
    delta_s = (omega0 * (r[_R_SHEAR:_R_SHEAR + 3] - quad)).astype(jnp.bfloat16)

    # Ghost correction: omega_learned * m[6:9] (ghost equilibrium is zero).
    delta_g = (omega_g * r[_R_GHOST:_R_GHOST + 3]).astype(jnp.bfloat16)

    corr = (jnp.dot(mi36_ref[...], delta_s, preferred_element_type=jnp.float32)
            + jnp.dot(mi69_ref[...], delta_g, preferred_element_type=jnp.float32))

    # Collision form: out = f - MINV_ne @ delta  (rows 0-2 are conserved).
    out_ref[...] = (fo[0:9].astype(jnp.float32) - corr).astype(out_ref.dtype)


# --------------------------------- host-side weight prep -------------------------------
def _build_weights(params):
    mmat = jnp.asarray(_M, jnp.float32)

    w1j, b1j = params["w1j"], params["b1j"]
    w2j, b2j = params["w2j"], params["b2j"]
    w1n, b1n = params["w1n"], params["b1n"]
    w2n, b2n = params["w2n"], params["b2n"]

    # Fused first layers of both MLPs on m and flip_xy(m) (flip folded by column
    # permutation), with M folded so the matmul acts directly on f.
    w1_all = jnp.concatenate([w1j, w1j[:, _FLIP], w1n, w1n[:, _FLIP]], axis=0)  # (96, 9)
    w1m = w1_all @ mmat                                                          # (96, 9)
    b1_all = jnp.concatenate([b1j, b1j, b1n, b1n])                               # (96,)

    # Stacked weight (128, 10): columns 0:9 act on f, column 9 on the ones row.
    mq = _M[3:6] - (1.0 / 3.0) * np.outer([1.0, 0.0, 1.0], _M[0])
    wstk = jnp.zeros((_N_STACK, 10), jnp.float32)
    wstk = wstk.at[_R_SHEAR:_R_SHEAR + 3, 0:9].set(jnp.asarray(mq, jnp.float32))
    wstk = wstk.at[_R_JA:_R_JA + 3, 0:9].set(jnp.asarray(_M[[1, 1, 2]], jnp.float32))
    wstk = wstk.at[_R_JB:_R_JB + 3, 0:9].set(jnp.asarray(_M[[1, 2, 2]], jnp.float32))
    wstk = wstk.at[_R_GHOST:_R_GHOST + 3, 0:9].set(jnp.asarray(_M[6:9], jnp.float32))
    wstk = wstk.at[_R_RHO, 0:9].set(jnp.asarray(_M[0], jnp.float32))
    wstk = wstk.at[_R_HIDDEN:, 0:9].set(w1m)
    wstk = wstk.at[_R_HIDDEN:, 9].set(b1_all)

    # Fused block-diagonal second layer; rows align with ghost moments 6,7,8:
    #   row 0: n_net(m)+n_net(flip m), row 1: j_net(m), row 2: j_net(flip m)
    z24 = jnp.zeros_like(w2j)
    w2_blk = jnp.concatenate(
        [
            jnp.concatenate([z24, z24, w2n, w2n], axis=1),
            jnp.concatenate([w2j, z24, z24, z24], axis=1),
            jnp.concatenate([z24, w2j, z24, z24], axis=1),
        ],
        axis=0,
    )                                                                            # (3, 96)
    b2_all = jnp.concatenate([2.0 * b2n, b2j, b2j]).reshape(3, 1)

    minv = jnp.asarray(_MINV, jnp.float32)
    mi36 = minv[:, 3:6]                                                          # (9, 3)
    mi69 = minv[:, 6:9]                                                          # (9, 3)

    mx = jnp.bfloat16
    return (wstk.astype(mx), w2_blk.astype(mx), b2_all,
            mi36.astype(mx), mi69.astype(mx))


# -------------------------------------- tiling ------------------------------------------
def _choose_tiling(n, cap=32768):
    """Pad the lattice to a multiple of 128 lanes and pick a lane tile.

    cap=32768 keeps the per-tile working set (~30 MiB incl. the f32 (128,TN)
    stacked-matmul result) inside the v7x 64 MiB VMEM.  The tail is handled by
    host-side padding (no ragged tiles, no whole-array fallback).  When >=2
    tiles fit we force grid>=2 so ("parallel",) can shard across both v7x TCs.
    """
    n_pad = ((n + 127) // 128) * 128
    tile = min(cap, n_pad)
    if n_pad >= 256:
        half = ((n_pad + 255) // 256) * 128          # ceil(n_pad/2) rounded to 128
        tile = min(tile, max(128, half))
    n_pad = ((n_pad + tile - 1) // tile) * tile
    return n_pad, tile


# -------------------------------------- wrapper -----------------------------------------
def init_params(key):
    ks = jax.random.split(key, 8)

    def lin(kw, kb, fan_out, fan_in):
        bound = 1.0 / np.sqrt(fan_in)
        w = jax.random.uniform(kw, (fan_out, fan_in), jnp.float32, -bound, bound)
        b = jax.random.uniform(kb, (fan_out,), jnp.float32, -bound, bound)
        return w, b

    w1j, b1j = lin(ks[0], ks[1], 24, 9)
    w2j, b2j = lin(ks[2], ks[3], 1, 24)
    w1n, b1n = lin(ks[4], ks[5], 24, 9)
    w2n, b2n = lin(ks[6], ks[7], 1, 24)
    return dict(w1j=w1j, b1j=b1j, w2j=w2j, b2j=b2j,
                w1n=w1n, b1n=b1n, w2n=w2n, b2n=b2n)


def learned_mrt(f, params, tau, tile_n=None, io_dtype=jnp.bfloat16):
    q, nx, ny = f.shape
    assert q == 9
    n = nx * ny
    if tile_n is None:
        n_pad, tile_n = _choose_tiling(n)
    else:
        tile_n = max(128, (tile_n // 128) * 128)
        n_pad = ((n + tile_n - 1) // tile_n) * tile_n
    grid = n_pad // tile_n

    # Ones row folds the first-layer biases into the stacked matmul; padded
    # lattice points are filled with 1.0 so rho > 0 (no inf/NaN in dead lanes).
    f2 = f.reshape(q, n)
    f_in = jnp.pad(f2, ((0, 1), (0, n_pad - n)), constant_values=1.0).astype(io_dtype)

    wstk, w2_blk, b2_all, mi36, mi69 = _build_weights(params)

    def fullspec(shape):
        return pl.BlockSpec(shape, lambda i: (0, 0))

    io_bytes = jnp.dtype(io_dtype).itemsize
    out = pl.pallas_call(
        functools.partial(learned_mrt_kernel, omega0=1.0 / float(tau)),
        out_shape=jax.ShapeDtypeStruct((q, n_pad), io_dtype),
        grid=(grid,),
        in_specs=[
            pl.BlockSpec((q + 1, tile_n), lambda i: (0, i)),
            fullspec((_N_STACK, 10)),
            fullspec((3, _N_HIDDEN)),
            fullspec((3, 1)),
            fullspec((9, 3)),
            fullspec((9, 3)),
        ],
        out_specs=pl.BlockSpec((q, tile_n), lambda i: (0, i)),
        compiler_params=pltpu.CompilerParams(
            dimension_semantics=("parallel",),
            vmem_limit_bytes=52 * 1024 * 1024,
        ),
        cost_estimate=pl.CostEstimate(
            flops=3300 * n_pad,
            transcendentals=8 * n_pad,
            bytes_accessed=(2 * q + 1) * io_bytes * n_pad,
        ),
    )(f_in, wstk, w2_blk, b2_all, mi36, mi69)

    return out[:, :n].reshape(q, nx, ny).astype(f.dtype)


# --------------------------- pure-JAX reference (for checking) ---------------------------
def learned_mrt_ref(f, params, tau):
    # TODO(synk): the real D2Q9Dellar moment_transform is not importable here;
    # the standard Dellar basis above is used for both kernel and reference.
    mmat = jnp.asarray(_M, jnp.float32)
    minv = jnp.asarray(_MINV, jnp.float32)
    m = jnp.einsum("ab,bxy->axy", mmat, f)              # (9, nx, ny)
    mt = jnp.transpose(m, (1, 2, 0))                    # (nx, ny, 9)
    mtf = mt[..., _FLIP]

    def net(w1, b1, w2, b2, x):
        h = jnp.maximum(jnp.einsum("...i,oi->...o", x, w1) + b1, 0.0)
        return jnp.einsum("...i,oi->...o", h, w2) + b2

    p = params
    tau_jx = 0.5 + jnp.exp(net(p["w1j"], p["b1j"], p["w2j"], p["b2j"], mt))
    tau_jy = 0.5 + jnp.exp(net(p["w1j"], p["b1j"], p["w2j"], p["b2j"], mtf))
    tau_n = 0.5 + jnp.exp(net(p["w1n"], p["b1n"], p["w2n"], p["b2n"], mt)
                          + net(p["w1n"], p["b1n"], p["w2n"], p["b2n"], mtf))
    taus = tau * jnp.ones_like(m)
    taus = taus.at[6].set(tau_n[..., 0]).at[7].set(tau_jx[..., 0]).at[8].set(tau_jy[..., 0])
    rho, jx, jy = m[0], m[1], m[2]
    meq = jnp.stack(
        [rho, jx, jy,
         rho / 3.0 + jx * jx / rho, jx * jy / rho, rho / 3.0 + jy * jy / rho,
         jnp.zeros_like(rho), jnp.zeros_like(rho), jnp.zeros_like(rho)])
    m_post = m - 1.0 / taus * (m - meq)
    return jnp.einsum("ab,bxy->axy", minv, m_post)


if __name__ == "__main__":
    key = jax.random.PRNGKey(0)
    kp, kf = jax.random.split(key)
    params = init_params(kp)
    tau = 0.8
    nx = ny = 16

    # positive, near-equilibrium populations (so rho > 0)
    w = jnp.asarray([4 / 9] + [1 / 9] * 4 + [1 / 36] * 4, jnp.float32)
    noise = 0.1 * jax.random.uniform(kf, (9, nx, ny), jnp.float32, -1.0, 1.0)
    f = w[:, None, None] * (1.0 + noise)

    out = learned_mrt(f, params, tau)
    out = jax.block_until_ready(out)

    ref = learned_mrt_ref(f, params, tau)
    np.testing.assert_allclose(np.asarray(out), np.asarray(ref), rtol=5e-2, atol=5e-3)
    print("KERNEL_OK")
</pallas_src>

<mosaic_0001>
module attributes {stable_mosaic.version = 11 : i64} {
  func.func @learned_mrt_kernel(%arg0: i32, %arg1: memref<10x128xbf16, #tpu.memory_space<vmem>>, %arg2: memref<128x10xbf16, #tpu.memory_space<vmem>>, %arg3: memref<3x96xbf16, #tpu.memory_space<vmem>>, %arg4: memref<3x1xf32, #tpu.memory_space<vmem>>, %arg5: memref<9x3xbf16, #tpu.memory_space<vmem>>, %arg6: memref<9x3xbf16, #tpu.memory_space<vmem>>, %arg7: memref<9x128xbf16, #tpu.memory_space<vmem>>) attributes {dimension_semantics = [#tpu.dimension_semantics<parallel>], iteration_bounds = array<i64: 2>, scalar_prefetch = 0 : i64, scratch_operands = 0 : i64, tpu.core_type = #tpu.core_type<tc>, window_params = [{transform_indices = @transform_0, window_bounds = array<i64: 10, 128>}, {pipeline_mode = #tpu.pipeline_mode<synchronous>, transform_indices = @transform_1, window_bounds = array<i64: 128, 10>}, {pipeline_mode = #tpu.pipeline_mode<synchronous>, transform_indices = @transform_2, window_bounds = array<i64: 3, 96>}, {pipeline_mode = #tpu.pipeline_mode<synchronous>, transform_indices = @transform_3, window_bounds = array<i64: 3, 1>}, {pipeline_mode = #tpu.pipeline_mode<synchronous>, transform_indices = @transform_4, window_bounds = array<i64: 9, 3>}, {pipeline_mode = #tpu.pipeline_mode<synchronous>, transform_indices = @transform_5, window_bounds = array<i64: 9, 3>}, {transform_indices = @transform_6, window_bounds = array<i64: 9, 128>}]} {
    %c0 = arith.constant 0 : index
    %c0_0 = arith.constant 0 : index
    %0 = vector.load %arg1[%c0, %c0_0] : memref<10x128xbf16, #tpu.memory_space<vmem>>, vector<10x128xbf16>
    %c0_1 = arith.constant 0 : index
    %c0_2 = arith.constant 0 : index
    %1 = vector.load %arg2[%c0_1, %c0_2] : memref<128x10xbf16, #tpu.memory_space<vmem>>, vector<128x10xbf16>
    %cst = arith.constant dense<0.000000e+00> : vector<128x128xf32>
    %2 = tpu.matmul %1, %0, %cst {dimension_numbers = #tpu.dot_dimension_numbers<[1], [0], [0], [1], [0, 0, 1, 1], [], []>} : vector<128x10xbf16>, vector<10x128xbf16>, vector<128x128xf32> -> vector<128x128xf32>
    %3 = vector.extract_strided_slice %2 {offsets = [32, 0], sizes = [96, 128], strides = [1, 1]} : vector<128x128xf32> to vector<96x128xf32>
    %cst_3 = arith.constant 0.000000e+00 : f32
    %4 = vector.broadcast %cst_3 : f32 to vector<96x128xf32>
    %5 = arith.maximumf %3, %4 : vector<96x128xf32>
    %6 = arith.truncf %5 : vector<96x128xf32> to vector<96x128xbf16>
    %c0_4 = arith.constant 0 : index
    %c0_5 = arith.constant 0 : index
    %7 = vector.load %arg3[%c0_4, %c0_5] : memref<3x96xbf16, #tpu.memory_space<vmem>>, vector<3x96xbf16>
    %cst_6 = arith.constant dense<0.000000e+00> : vector<3x128xf32>
    %8 = tpu.matmul %7, %6, %cst_6 {dimension_numbers = #tpu.dot_dimension_numbers<[1], [0], [0], [1], [0, 0, 1, 1], [], []>} : vector<3x96xbf16>, vector<96x128xbf16>, vector<3x128xf32> -> vector<3x128xf32>
    %c0_7 = arith.constant 0 : index
    %c0_8 = arith.constant 0 : index
    %9 = vector.load %arg4[%c0_7, %c0_8] : memref<3x1xf32, #tpu.memory_space<vmem>>, vector<3x1xf32>
    %10 = vector.broadcast %9 : vector<3x1xf32> to vector<3x128xf32>
    %11 = arith.addf %8, %10 : vector<3x128xf32>
    %12 = math.exp %11 : vector<3x128xf32>
    %cst_9 = arith.constant 5.000000e-01 : f32
    %13 = vector.broadcast %cst_9 : f32 to vector<3x128xf32>
    %14 = arith.addf %13, %12 : vector<3x128xf32>
    %15 = tpu.reciprocal %14 {approx = true} : vector<3x128xf32> -> vector<3x128xf32>
    %16 = vector.extract_strided_slice %2 {offsets = [27, 0], sizes = [1, 128], strides = [1, 1]} : vector<128x128xf32> to vector<1x128xf32>
    %17 = tpu.reciprocal %16 {approx = true} : vector<1x128xf32> -> vector<1x128xf32>
    %18 = vector.extract_strided_slice %2 {offsets = [8, 0], sizes = [3, 128], strides = [1, 1]} : vector<128x128xf32> to vector<3x128xf32>
    %19 = vector.broadcast %17 : vector<1x128xf32> to vector<3x128xf32>
    %20 = arith.mulf %19, %18 : vector<3x128xf32>
    %21 = vector.extract_strided_slice %2 {offsets = [16, 0], sizes = [3, 128], strides = [1, 1]} : vector<128x128xf32> to vector<3x128xf32>
    %22 = arith.mulf %20, %21 : vector<3x128xf32>
    %23 = vector.extract_strided_slice %2 {offsets = [0, 0], sizes = [3, 128], strides = [1, 1]} : vector<128x128xf32> to vector<3x128xf32>
    %24 = arith.subf %23, %22 : vector<3x128xf32>
    %cst_10 = arith.constant 1.250000e+00 : f32
    %25 = vector.broadcast %cst_10 : f32 to vector<3x128xf32>
    %26 = arith.mulf %25, %24 : vector<3x128xf32>
    %27 = arith.truncf %26 : vector<3x128xf32> to vector<3x128xbf16>
    %28 = vector.extract_strided_slice %2 {offsets = [24, 0], sizes = [3, 128], strides = [1, 1]} : vector<128x128xf32> to vector<3x128xf32>
    %29 = arith.mulf %15, %28 : vector<3x128xf32>
    %30 = arith.truncf %29 : vector<3x128xf32> to vector<3x128xbf16>
    %c0_11 = arith.constant 0 : index
    %c0_12 = arith.constant 0 : index
    %31 = vector.load %arg5[%c0_11, %c0_12] : memref<9x3xbf16, #tpu.memory_space<vmem>>, vector<9x3xbf16>
    %cst_13 = arith.constant dense<0.000000e+00> : vector<9x128xf32>
    %32 = tpu.matmul %31, %27, %cst_13 {dimension_numbers = #tpu.dot_dimension_numbers<[1], [0], [0], [1], [0, 0, 1, 1], [], []>} : vector<9x3xbf16>, vector<3x128xbf16>, vector<9x128xf32> -> vector<9x128xf32>
    %c0_14 = arith.constant 0 : index
    %c0_15 = arith.constant 0 : index
    %33 = vector.load %arg6[%c0_14, %c0_15] : memref<9x3xbf16, #tpu.memory_space<vmem>>, vector<9x3xbf16>
    %cst_16 = arith.constant dense<0.000000e+00> : vector<9x128xf32>
    %34 = tpu.matmul %33, %30, %cst_16 {dimension_numbers = #tpu.dot_dimension_numbers<[1], [0], [0], [1], [0, 0, 1, 1], [], []>} : vector<9x3xbf16>, vector<3x128xbf16>, vector<9x128xf32> -> vector<9x128xf32>
    %35 = arith.addf %32, %34 : vector<9x128xf32>
    %36 = vector.extract_strided_slice %0 {offsets = [0, 0], sizes = [9, 128], strides = [1, 1]} : vector<10x128xbf16> to vector<9x128xbf16>
    %37 = arith.extf %36 : vector<9x128xbf16> to vector<9x128xf32>
    %38 = arith.subf %37, %35 : vector<9x128xf32>
    %39 = arith.truncf %38 : vector<9x128xf32> to vector<9x128xbf16>
    %c0_17 = arith.constant 0 : index
    %c0_18 = arith.constant 0 : index
    %40 = vector.load %arg7[%c0_17, %c0_18] : memref<9x128xbf16, #tpu.memory_space<vmem>>, vector<9x128xbf16>
    tpu.vector_store %arg7[%c0_17, %c0_18], %39 {strides = array<i32>} : memref<9x128xbf16, #tpu.memory_space<vmem>>, vector<9x128xbf16>,
    return
  }
  func.func @transform_0(%arg0: i32) -> (i32, i32) {
    %c0_i32 = arith.constant 0 : i32
    %c0_i32_0 = arith.constant 0 : i32
    return %c0_i32, %arg0 : i32, i32
  }
  func.func @transform_1(%arg0: i32) -> (i32, i32) {
    %c0_i32 = arith.constant 0 : i32
    %c0_i32_0 = arith.constant 0 : i32
    %c0_i32_1 = arith.constant 0 : i32
    return %c0_i32, %c0_i32_0 : i32, i32
  }
  func.func @transform_2(%arg0: i32) -> (i32, i32) {
    %c0_i32 = arith.constant 0 : i32
    %c0_i32_0 = arith.constant 0 : i32
    %c0_i32_1 = arith.constant 0 : i32
    return %c0_i32, %c0_i32_0 : i32, i32
  }
  func.func @transform_3(%arg0: i32) -> (i32, i32) {
    %c0_i32 = arith.constant 0 : i32
    %c0_i32_0 = arith.constant 0 : i32
    %c0_i32_1 = arith.constant 0 : i32
    return %c0_i32, %c0_i32_0 : i32, i32
  }
  func.func @transform_4(%arg0: i32) -> (i32, i32) {
    %c0_i32 = arith.constant 0 : i32
    %c0_i32_0 = arith.constant 0 : i32
    %c0_i32_1 = arith.constant 0 : i32
    return %c0_i32, %c0_i32_0 : i32, i32
  }
  func.func @transform_5(%arg0: i32) -> (i32, i32) {
    %c0_i32 = arith.constant 0 : i32
    %c0_i32_0 = arith.constant 0 : i32
    %c0_i32_1 = arith.constant 0 : i32
    return %c0_i32, %c0_i32_0 : i32, i32
  }
  func.func @transform_6(%arg0: i32) -> (i32, i32) {
    %c0_i32 = arith.constant 0 : i32
    %c0_i32_0 = arith.constant 0 : i32
    return %c0_i32, %arg0 : i32, i32
  }
}

</mosaic_0001>

<bundles_post_ra>
// kernel: tpu_custom_call.1
= control target key start
LH: loop header
LB: loop body
LE: loop exit
PB: predicated region body
PF: predicated region fallthrough
CT: control target
= control target key end

     0   :  { %11 = vsyncpa [#allocation4], 0  ;;  %s1257_s0 = inlined_call_operand.vmem [shape: bf16[10,256], index: 0, kind: input, shape index: {}]   ;;  %s1258_s1 = inlined_call_operand.vmem [shape: bf16[128,10], index: 1, kind: input, shape index: {}]   ;;  %s1259_s2 = inlined_call_operand.vmem [shape: bf16[3,96], index: 2, kind: input, shape index: {}]   ;;  %s1260_s3 = inlined_call_operand.vmem [shape: f32[3,1], index: 3, kind: input, shape index: {}]   ;;  %s1261_s4 = inlined_call_operand.vmem [shape: bf16[9,3], index: 4, kind: input, shape index: {}]   ;;  %s1262_s5 = inlined_call_operand.vmem [shape: bf16[9,3], index: 5, kind: input, shape index: {}]   ;;  %s1263_s6 = inlined_call_operand.hbm [shape: bf16[9,256], index: 6, kind: output, shape index: {}]  }
   0x1   :  { %13 = vsyncpa [#allocation4 + $0x1], 0  ;;  %s1066_s21 = smov 0   ;;  %s1068_s22 = smov 0  }
   0x2   :  { %s1070_s23 = smov 0   ;;  %s1072_s24 = smov 0  }
   0x3 LB: > { %s782_s25 = sadd.s32 4294967295, %s1021_s24   ;;  %s783_s26 = sadd.s32 4294967294, %s1021_s24   ;;  %s1021_s24 = sphi %s1072_s24, %s1269_s24   ;;  %s1017_s23 = sphi %s1070_s23, %s1268_s23   ;;  %s1013_s22 = sphi %s1068_s22, %s1267_s22   ;;  %s1009_s21 = sphi %s1066_s21, %s1266_s21  }
   0x4   : > { %s1089_s27 = sadd.s32 1, %s1021_s24   ;;  %s26_s28 = sadd.s32 1, %s1017_s23 }
   0x5   : > { %s23_s29 = ssub.s32 %s1021_s24, %s1089_s27  ;;  %p33_p0 = scmp.ne.s32.totalorder %s1017_s23, %s1013_s22 }
   0x6   : > { %p24_p1 = scmp.eq.s32.totalorder %s23_s29, 0  ;;  %p34_p2 = scmp.eq.s32.totalorder %s1021_s24, 0 }
   0x7   : > { %p168_p3 = scmp.eq.s32.totalorder %s782_s25, 1  ;;  %p173_p4 = scmp.ne.s32.totalorder %s1013_s22, %s1009_s21 }
   0x8   : > { %s1102_s30 = scalar_select %p24_p1, %s1017_s23, %s26_s28  }
   0x9   : > { %p35_p5 = por %p34_p2, %p33_p0  ;;  %p1104_p6 = por %p168_p3, %p33_p0 }
   0xa   : > { %p174_p7 = scmp.eq.s32.totalorder %s783_s26, 1  ;;  %p785_p9 = scmp.ge.s32.totalorder %s1021_s24, 2 }
   0xc   : > { %p1108_p8 = por %p174_p7, %p173_p4  ;;  %205 = sbr.rel (%p785_p9) target bundleno = 26 (0x1a), region = 36 }
  0x13   : > { %208 = sbr.rel (!%p35_p5) target bundleno = 26 (0x1a), region = 40  ;;  %s210_s9 = sand.u32 (%p35_p5), 1, %s1017_s23  }
  0x14   : > { %s787_s10 = sshll.u32 (%p35_p5), %s1021_s24, 2  ;;  %s786_s11 = sshll.u32 (%p35_p5), %s210_s9, 3 }
  0x15   : > { %s214_s14 = scalar_lea.vmem (%p35_p5), %s1257_s0, %s787_s10  ;;  %s212_s15 = scalar_lea.vmem (%p35_p5), [#allocation2], %s786_s11 }
  0x16   : > { %v230_v0 = vld [vmem:[%s214_s14] sm:$0xf] (%p35_p5)  ;;  %v232_v1 = vld [vmem:[%s214_s14 + $0x8] sm:$0xf] (%p35_p5) }
  0x17   : > { %231 = vst [vmem:[%s212_s15] sm:$0xf] (%p35_p5), %v230_v0  ;;  %233 = vst [vmem:[%s212_s15 + $0x4] sm:$0xf] (%p35_p5), %v232_v1 }
  0x1a PF: > { %p788_p10 = scmp.ge.s32.totalorder %s1021_s24, 1  ;;  %p259_p11 = scmp.lt.s32.totalorder %s1021_s24, 3 }
  0x1c   : > { %p260_p12 = pnand %p788_p10, %p259_p11 }
  0x1d   : > { %s266_s16 = sand.u32 (!%p260_p12), 1, %s1013_s22   ;;  %v943_v2 = vld [vmem:[%s1258_s1] sm:$0xff] (!%p260_p12)   ;;  %vm359_vm0 = vcmask (!%p260_p12), 80896   ;;  %vm384_vm1 = vcmask (!%p260_p12), 1044480   ;;  %v944_v7 = vld [vmem:[%s1258_s1 + $0x8] sm:$0xff] (!%p260_p12)   ;;  %v945_v8 = vld [vmem:[%s1258_s1 + $0x10] sm:$0xff] (!%p260_p12)   ;;  %v559_v21 = vlaneseq (!%p260_p12) }
  0x1e   : > { %263 = sbr.rel (%p260_p12) target bundleno = 785 (0x311), region = 81  ;;  %s1125_s17 = sshll.u32 (!%p260_p12), %s266_s16, 3  ;;  %843 = vmatprep.mubr.msk.bf16.mxu0 (!%p260_p12), %vm359_vm0, %v943_v2  ;;  %v949_v9 = vld [vmem:[%s1258_s1 + $0x30] sm:$0xff] (!%p260_p12)   ;;  %v950_v10 = vld [vmem:[%s1258_s1 + $0x38] sm:$0xff] (!%p260_p12)   ;;  %v947_v12 = vld [vmem:[%s1258_s1 + $0x20] sm:$0xff] (!%p260_p12)   ;;  %v1023_v14 = vmov (!%p260_p12), 0.0  }
  0x1f   : > { %s268_s20 = scalar_lea.vmem (!%p260_p12), [#allocation2], %s1125_s17  ;;  %855 = vmatprep.mubr.msk.bf16.mxu1 (!%p260_p12), %vm359_vm0, %v949_v9  ;;  %v946_v11 = vld [vmem:[%s1258_s1 + $0x18] sm:$0xff] (!%p260_p12)   ;;  %v948_v13 = vld [vmem:[%s1258_s1 + $0x28] sm:$0xff] (!%p260_p12)   ;;  %vm1024_vm2 = vmmov (!%p260_p12), 0   ;;  %v504_v15 = vld [vmem:[%s1260_s3] sm:$0x7] (!%p260_p12) }
  0x20   : > { %v1131_v3 = vld [vmem:[%s268_s20] sm:$0xf] (!%p260_p12)  ;;  %v1133_v4 = vld [vmem:[%s268_s20 + $0x4] sm:$0x1] (!%p260_p12)  ;;  %v1025_v16 = vmov (!%p260_p12), 0   ;;  %v560_v30 = vshrl.u32 (!%p260_p12), %v559_v21, 7 }
  0x21   : > { %v799_v5 = vcombine.low (!%p260_p12), %v1131_v3, %v1133_v4  ;;  %941 = vset.pattern.permute.xlu0 (!%p260_p12), %v1025_v16  ;;  %v503_v59 = vld [vmem:[%s1259_s2] sm:$0x3] (!%p260_p12)  ;;  %vm510_vm3 = vcmask (!%p260_p12), 785408   ;;  %vm583_vm4 = vcmask (!%p260_p12), 1040384   ;;  %vm584_vm5 = vcmask (!%p260_p12), 1041408   ;;  %s294_s15 = scalar_lea.vmem (!%p260_p12), [#allocation3], %s1125_s17 }
  0x22   : > { %507 = vperm.xlu0 (!%p260_p12), %941, %v504_v15   ;;  %v561_v35 = vsub.s32 (!%p260_p12), 3, %v560_v30  ;;  %vm579_vm6 = vcmask (!%p260_p12), 23552   ;;  %v684_v21 = vunpack.c.l.bf16 (!%p260_p12), %v1133_v4  ;;  %s715_s18 = sshll.u32 (!%p260_p12), %s294_s15, 4  ;;  %vm697_vm7 = vsmask.f32 (!%p260_p12), 256  ;;  %s816_s19 = sshll.u32 (!%p260_p12), %s782_s25, 6  ;;  %s1205_s18 = int_to_ptr.vmem [resolvable:$true] %s715_s18 }
  0x23   : > { %893 = vmatprep.subr.msk.bf16.mxu0 (!%p260_p12), %vm384_vm1, %v799_v5  ;;  %v386_v6 = vsel (!%p260_p12), %vm384_vm1, %v799_v5, 0  ;;  %894 = vmatprep.subr.msk.bf16.mxu1 (!%p260_p12), %vm384_vm1, %v799_v5  ;;  %vm698_vm8 = vmand (!%p260_p12), %vm583_vm4, %vm697_vm7  ;;  %s1211_s26 = scalar_lea.hbm (!%p260_p12), %s1263_s6, %s816_s19  ;;  %s1215_s25 = scalar_lea.sflag (!%p260_p12), [#allocation4], %s266_s16 }
  0x24   : > { %842 = vmatpush3.bf16.msra.mxu0 (!%p260_p12), %v386_v6  ;;  %888 = vmatpush3.bf16.msra.mxu1 (!%p260_p12), %v386_v6  ;;  %s959_s28 = scalar_lea.vmem (!%p260_p12), %s1205_s18, 128  ;;  %s1027_s29 = smov (!%p260_p12), [#allocation3]  }
  0x25   : > { %859 = vmatprep.subr.bf16.mxu0 %v1023_v14  ;;  %875 = vmatprep.subr.bf16.mxu1 %v1023_v14  ;;  %p960_p13 = scmp.ne.s32.totalorder %s1205_s18, %s959_s28  ;;  %s963_s9 = sshll.u32 %s1027_s29, 4  ;;  %s964_s9 = int_to_ptr.vmem [resolvable:$false] %s963_s9 }
  0x26   : > { %s965_s10 = scalar_lea.vmem %s964_s9, 256  ;;  %p966_p2 = scmp.lt.s32.totalorder %s1205_s18, %s964_s9 }
  0x27   : > { %844 = vmatmul.mubr.msk.bf16.vlgmr.msra.gmra.mrb[0].mxu0 %vm359_vm0, %v944_v7  ;;  %856 = vmatmul.mubr.msk.bf16.vlgmr.msra.gmra.mrb[0].mxu1 %vm359_vm0, %v950_v10  ;;  %v1026_v10 = vmov 65535   ;;  %p961_p0 = pnand %p960_p13, %p1104_p6  ;;  %p967_p3 = scmp.lt.s32.totalorder %s965_s10, %s959_s28 }
  0x28   : > { %847 = vmatprep.mubr.msk.bf16.mxu0 %vm359_vm0, %v945_v8  ;;  %877 = vmatprep.mubr.msk.bf16.mxu1 %vm1024_vm2, %v1023_v14 }
  0x29   : > { %p962_p1 = pneg %p961_p0  ;;  %p968_p4 = por %p967_p3, %p966_p2 }
  0x2b   : > { %p969_p5 = pnand %p968_p4, %p962_p1 }
  0x2f   : > { %848 = vmatmul.mubr.msk.bf16.gmra.mrb[4].mxu0 %vm359_vm0, %v946_v11  ;;  %v585_v11 = vsel %vm583_vm4, 4294967295, %v1026_v10 }
  0x30   : > { %851 = vmatprep.mubr.msk.bf16.mxu0 %vm359_vm0, %v947_v12 }
  0x37   : > { %852 = vmatmul.mubr.msk.bf16.gmra.mrb[8].mxu0 %vm359_vm0, %v948_v13  ;;  %v586_v13 = vsel %vm584_vm5, %v585_v11, 0 }
  0x38   : > { %871 = vmatprep.mubr.msk.bf16.mxu0 %vm1024_vm2, %v1023_v14 }
  0xa1   : > { %v508_v60 = vpop.permute.xlu0 %507 }
  0xfa   : > { %v845_v17 = vpop.f32.mrb[0].mxu0  ;;  %v857_v19 = vpop.f32.mrb[0].mxu1 }
  0xfb   : > { %v1175_v18 = vpop.f32.mrb[1].mxu0  ;;  %v495_v22 = vmax.f32 %v857_v19, 0.0  ;;  %v470_v23 = vpop.f32.mrb[1].mxu1  ;;  %v952_v19 = vld [vmem:[%s1261_s4] sm:$0x1f]  }
  0xfc   : > { %v1177_v20 = vpop.f32.mrb[2].mxu0  ;;  %v493_v25 = vmax.f32 %v470_v23, 0.0  ;;  %v858_v26 = vpop.f32.mrb[2].mxu1 }
  0xfd   : > { %953 = vrcp.f32 %v1177_v20  ;;  %v425_v24 = vpop.f32.mrb[3].mxu0  ;;  %v496_v27 = vmax.f32 %v858_v26, 0.0  ;;  %v473_v28 = vpop.f32.mrb[3].mxu1 }
  0xfe   : > { %v494_v29 = vmax.f32 %v473_v28, 0.0 }
  0xff   : > { %v502_v31 = vpack.c.bf16 %v496_v27, %v495_v22 }
 0x100   : > { %v501_v32 = vpack.c.bf16 %v494_v29, %v493_v25 }
 0x102   : > { %v849_v33 = vpop.f32.mrb[4].mxu0 }
 0x103   : > { %v438_v34 = vpop.f32.mrb[5].mxu0  ;;  %v487_v37 = vmax.f32 %v849_v33, 0.0 }
 0x104   : > { %v850_v36 = vpop.f32.mrb[6].mxu0  ;;  %v485_v40 = vmax.f32 %v438_v34, 0.0 }
 0x105   : > { %v488_v38 = vmax.f32 %v850_v36, 0.0  ;;  %v441_v39 = vpop.f32.mrb[7].mxu0 }
 0x106   : > { %v486_v41 = vmax.f32 %v441_v39, 0.0 }
 0x107   : > { %v954_v42 = vpop.eup %953  ;;  %v498_v43 = vpack.c.bf16 %v488_v38, %v487_v37 }
 0x108   : > { %v562_v44 = vrot.slane %v954_v42, %v561_v35  ;;  %v497_v45 = vpack.c.bf16 %v486_v41, %v485_v40 }
 0x10a   : > { %v563_v46 = vmul.f32 %v562_v44, %v425_v24  ;;  %v853_v47 = vpop.f32.mrb[8].mxu0  ;;  %860 = vmatpush3.bf16.msra.mxu0 %v497_v45 }
 0x10b   : > { %v454_v48 = vpop.f32.mrb[9].mxu0  ;;  %861 = vmatprep.subr.bf16.mxu0 %v1023_v14  ;;  %v491_v51 = vmax.f32 %v853_v47, 0.0 }
 0x10c   : > { %v564_v49 = vmul.f32 %v845_v17, %v563_v46  ;;  %v854_v50 = vpop.f32.mrb[10].mxu0  ;;  %v489_v55 = vmax.f32 %v454_v48, 0.0  ;;  %v951_v17 = vld [vmem:[%s1262_s5] sm:$0x1f]  }
 0x10d   : > { %v492_v52 = vmax.f32 %v854_v50, 0.0  ;;  %v457_v53 = vpop.f32.mrb[11].mxu0 }
 0x10e   : > { %v565_v54 = vsub.f32 %v1175_v18, %v564_v49  ;;  %v490_v56 = vmax.f32 %v457_v53, 0.0  ;;  %862 = vmatpush3.bf16.msra.mxu0 %v498_v43 }
 0x10f   : > { %v500_v57 = vpack.c.bf16 %v492_v52, %v491_v51  ;;  %863 = vmatprep.subr.bf16.mxu0 %v1023_v14 }
 0x110   : > { %v499_v58 = vpack.c.bf16 %v490_v56, %v489_v55  ;;  %v566_v8 = vmul.f32 1.25, %v565_v54 }
 0x112   : > { %864 = vmatpush3.bf16.msra.mxu0 %v499_v58  ;;  %v567_v15 = vpack.c.bf16 %v566_v8, %v566_v8 }
 0x113   : > { %865 = vmatprep.subr.bf16.mxu0 %v1023_v14 }
 0x114   : > { %v640_v18 = vand.u32 %v586_v13, %v567_v15 }
 0x116   : > { %866 = vmatpush3.bf16.msra.mxu0 %v500_v57 }
 0x117   : > { %867 = vmatprep.subr.bf16.mxu0 %v1023_v14 }
 0x11a   : > { %868 = vmatpush3.bf16.msra.mxu0 %v501_v32 }
 0x11b   : > { %869 = vmatprep.subr.bf16.mxu0 %v1023_v14 }
 0x11e   : > { %870 = vmatpush3.bf16.msra.mxu0 %v502_v31 }
 0x121   : > { %872 = vmatmul.mubr.msk.bf16.vlgmr.msra.gmra.mrb[12].mxu0 %vm510_vm3, %v503_v59 }
 0x1f4   : > { %v548_v61 = vpop.f32.mrb[12].mxu0 }
 0x1f5   : > { %v549_v62 = vadd.f32 %v548_v61, %v508_v60  ;;  %v873_v63 = vpop.f32.mrb[13].mxu0 }
 0x1f6   : > { %v551_v0 = vpop.f32.mrb[14].mxu0 }
 0x1f7   : > { %v554_v1 = vmul.f32 1.442695, %v549_v62  ;;  %v874_v2 = vpop.f32.mrb[15].mxu0 }
 0x1f9   : > { %955 = vpow2.f32 %v554_v1 }
 0x203   : > { %v956_v5 = vpop.eup %955 }
 0x204   : > { %v556_v6 = vadd.f32 0.5, %v956_v5 }
 0x206   : > { %957 = vrcp.f32 %v556_v6 }
 0x210   : > { %v958_v7 = vpop.eup %957 }
 0x211   : > { %v568_v9 = vmul.f32 %v958_v7, %v1177_v20  ;;  %v683_v20 = vunpack.c.l.bf16 %v1131_v3  ;;  %v699_v3 = vld [vmem:[%s294_s15 + $0x4] sm:$0x1] }
 0x213   : > { %v569_v12 = vpack.c.bf16 %v568_v9, %v568_v9 }
 0x215   : > { %v588_v16 = vand.u32 %v586_v13, %v569_v12 }
 0x217   : > { %876 = vmatpush3.bf16.msra.mxu1 %v588_v16 }
 0x218   : > { %881 = vmatprep.subr.bf16.mxu1 %v1023_v14 }
 0x21a   : > { %878 = vmatmul.mubr.msk.bf16.vlgmr.msra.gmra.mrb[4].mxu1 %vm579_vm6, %v951_v17 }
 0x21b   : > { %882 = vmatpush3.bf16.msra.mxu1 %v640_v18  ;;  %883 = vmatprep.mubr.msk.bf16.mxu1 %vm1024_vm2, %v1023_v14 }
 0x226   : > { %884 = vmatmul.mubr.msk.bf16.vlgmr.msra.gmra.mrb[4].mxu1 %vm579_vm6, %v952_v19 }
 0x2f9   : > { %v676_v22 = vpop.f32.mrb[4].mxu1 }
 0x2fa   : > { %v685_v23 = vsub.f32 %v683_v20, %v676_v22  ;;  %v885_v24 = vpop.f32.mrb[5].mxu1 }
 0x2fb   : > { %v679_v25 = vpop.f32.mrb[6].mxu1 }
 0x2fc   : > { %v819_v14 = vpack.c.bf16 %v685_v23, %v685_v23  ;;  %v686_v26 = vsub.f32 %v684_v21, %v679_v25  ;;  %v886_v27 = vpop.f32.mrb[7].mxu1 }
 0x2fe   : > { %695 = vst [vmem:[%s294_s15] sm:$0xf] %v819_v14  ;;  %v820_v4 = vpack.c.bf16 %v686_v26, %v686_v26 }
 0x300   : > { %v700_v28 = vsel %vm698_vm8, %v820_v4, %v699_v3 }
 0x301   : > { %701 = vst [vmem:[%s294_s15 + $0x4] sm:$0x1] %v700_v28 }
 0x302   : > { %972 = shalt.err (!%p969_p5)
}
 0x303   : > { %s973_s16 = scalar_lea.hbm %s1211_s26, 128  ;;  %s977_s13 = scalar_lea.hbm %s1263_s6, 256 }
 0x304   : > { %p974_p7 = scmp.ne.s32.totalorder %s1211_s26, %s973_s16  ;;  %p978_p12 = scmp.lt.u32.totalorder %s1211_s26, %s1263_s6 }
 0x305   : > { %p979_p13 = scmp.lt.u32.totalorder %s977_s13, %s973_s16  ;;  %p981_p1 = scmp.lt.u32.totalorder %s973_s16, %s1211_s26 }
 0x306   : > { %p975_p10 = pnand %p974_p7, %p1104_p6 }
 0x307   : > { %p980_p0 = por %p979_p13, %p978_p12 }
 0x308   : > { %p976_p11 = pneg %p975_p10 }
 0x309   : > { %p982_p2 = por %p981_p1, %p980_p0 }
 0x30b   : > { %p983_p3 = pnand %p982_p2, %p976_p11 }
 0x30d   : > { %986 = shalt.err (!%p983_p3)
}
 0x30e   : > { %s1028_s19 = smov 64   ;;  %s1029_s17 = smov 128  }
 0x30f   : > { %s1030_s20 = smov 4  }
 0x310   : > { %895 = dma.vmem_to_hbm [thread:$0]  (%p1104_p6), %s1205_s18, 128, %s1211_s26, %s1215_s25, %s1028_s19, %s1029_s17, %s1030_s20  }
 0x311 PF: > { %s730_s28 = sand.u32 1, %s1009_s21   ;;  %p898_p4 = pnand %p785_p9, %p1108_p8 }
 0x312   : > { %s731_s29 = scalar_lea.sflag [#allocation4], %s730_s28 }
 0x313   : > { %1004 = dma.done.wait (!%p898_p4), %s731_s29, 128  }
 0x314   : > { %1006 = vsyncadd (!%p898_p4), %s731_s29, 4294967168  ;;  %p16_p5 = scmp.ge.s32.totalorder %s1089_s27, 4   ;;  %s1266_s21 = smov %s1013_s22 }
 0x315   : > { %s1267_s22 = smov %s1017_s23  ;;  %s1268_s23 = smov %s1102_s30 }
 0x316   : > { %s1269_s24 = smov %s1089_s27  ;;  %18 = sbr.rel (!%p16_p5) target bundleno = 3 (0x3), region = 125 }
 0x31d   :  { %736 = vsyncpa [#allocation4], 1 }
 0x31e   :  { %738 = vsyncpa [#allocation4 + $0x1], 1 }

</bundles_post_ra>
